<compile_context>
chip_gen: v6e
topology: v6e:2x2x1
jax: 0.10.0
libtpu: 0.0.40
codegen_flags: <defaults>
</compile_context>

<pallas_src>
import functools
import math

import jax
import jax.numpy as jnp
from jax import lax
from jax.experimental import pallas as pl
from jax.experimental.pallas import tpu as pltpu

# --- module hyper-parameters (module defaults) -------------------------------
IN_FEATURES = 128         # module default
OUT_FEATURES = 200        # module default (NOT lane-aligned -> exercises padding)
S = 32.0
M = 0.5
REG_COEFF = 0.008
COS_M = math.cos(M)
SIN_M = math.sin(M)
THRESHOLD = math.cos(math.pi - M)
MM = math.sin(math.pi - M) * M


# -----------------------------------------------------------------------------
# Pre-step kernel (one invocation, O(B*D)):
#   * l2-normalize the embeddings once (reused by every C tile of the fused
#     kernel),
#   * compute target_logit from the B gathered classifier columns,
#   * compute cos_theta_m, final_target_logit (per-row margin math hoisted out
#     of the C-tiled body),
#   * update the t buffer.
# -----------------------------------------------------------------------------
def _prestep_kernel(emb_ref, kcol_ref, t_ref,
                    embn_ref, ctm_ref, ftl_ref, tnew_ref):
    emb = emb_ref[...].astype(jnp.float32)                        # (B, D)
    inv_e = lax.rsqrt(jnp.sum(emb * emb, axis=1, keepdims=True))  # EUP rsqrt
    emb_n = emb * inv_e
    embn_ref[...] = emb_n

    # gathered target columns, one per row: l2_norm(kernel[:, label], axis=0)
    kcol = kcol_ref[...].astype(jnp.float32)                      # (B, D)
    inv_k = lax.rsqrt(jnp.maximum(jnp.sum(kcol * kcol, axis=1, keepdims=True),
                                  1e-30))
    kcol_n = kcol * inv_k

    # target_logit = clamp(cos_theta)[row, label[row]]
    tl = jnp.sum(emb_n * kcol_n, axis=1, keepdims=True)           # (B, 1)
    tl = jnp.clip(tl, -1.0, 1.0)

    sin_theta = jnp.sqrt(jnp.maximum(0.0, 1.0 - tl * tl))         # NaN guard
    ctm = tl * COS_M - sin_theta * SIN_M
    ftl = jnp.where(tl > THRESHOLD, ctm, tl - MM)

    ctm_ref[...] = ctm
    ftl_ref[...] = ftl
    # t = mean(target_logit) * 0.01 + 0.99 * t
    tnew_ref[0] = jnp.mean(tl) * 0.01 + (1.0 - 0.01) * t_ref[0]


# -----------------------------------------------------------------------------
# Fused main kernel (grid over C tiles, "parallel" -- no cross-tile state):
#   normalize the classifier tile, matmul on the MXU, clamp, hard-example
#   reweight, scatter of the precomputed final target logit, scale by s and
#   add the precomputed reg_loss scalar.  One B x C HBM write total.
# -----------------------------------------------------------------------------
def _fused_kernel(embn_ref, ker_ref, label_ref, ctm_ref, ftl_ref,
                  tnew_ref, reg_ref, out_ref, *, matmul_dtype):
    j = pl.program_id(0)
    B, tc = out_ref.shape

    emb_n = embn_ref[...]                                         # (B, D) f32
    ker = ker_ref[...].astype(jnp.float32)                        # (D, tc)
    # l2_norm(kernel, axis=0): column norms are tile-local under C tiling.
    # eps guard keeps the zero padded columns NaN-free (they get sliced off).
    inv = lax.rsqrt(jnp.maximum(jnp.sum(ker * ker, axis=0, keepdims=True),
                                1e-30))
    ker_n = ker * inv

    cos = jnp.dot(emb_n.astype(matmul_dtype), ker_n.astype(matmul_dtype),
                  preferred_element_type=jnp.float32)             # MXU
    cos = jnp.clip(cos, -1.0, 1.0)

    t_new = tnew_ref[0]
    reg = reg_ref[0]
    ctm = ctm_ref[...]                                            # (B, 1)
    ftl = ftl_ref[...]                                            # (B, 1)

    # cos_theta[mask] = hard * (t + hard)
    mask = cos > ctm
    cos = jnp.where(mask, cos * (t_new + cos), cos)

    # scatter_: overwrite the target column with final_target_logit
    labels = label_ref[...]                                       # (B, 1)
    col = lax.broadcasted_iota(jnp.int32, (B, tc), 1) + j * tc
    onehot = col == labels
    cos = jnp.where(onehot, jnp.broadcast_to(ftl, (B, tc)), cos)

    out_ref[...] = cos * S + reg


# -----------------------------------------------------------------------------
# Wrapper
# -----------------------------------------------------------------------------
def _choose_class_tile(c_pad, b, d, vmem_budget_bytes=12 << 20):
    """Largest multiple of 128 dividing c_pad whose double-buffered working set
    fits a v5e-safe VMEM budget. At small C this returns c_pad (n_c = 1)."""
    assert c_pad % 128 == 0
    tc = c_pad
    while tc > 128:
        per_tile = 4 * (d * tc + b * tc)          # classifier tile + out tile
        resident = 4 * (b * d + 8 * b)            # emb_n + per-row vectors
        if c_pad % tc == 0 and 2 * per_tile + resident <= vmem_budget_bytes:
            return tc
        tc -= 128
    return 128


def curricular_face(embeddings, kernel, label, weight, t, *,
                    class_tile=None, matmul_dtype=jnp.float32):
    B, D = embeddings.shape
    C = kernel.shape[1]

    # reg_loss is a batch-independent scalar; plain-JAX reduce (a full (C, D)
    # VMEM block would not fit scoped VMEM at production class counts).
    reg = (REG_COEFF * jnp.sum(jnp.square(weight.astype(jnp.float32)))
           ).reshape(1)

    label = label.astype(jnp.int32)
    label2d = label.reshape(B, 1)

    # Gather of the B target classifier columns -- O(B*D), plain JAX.
    ker_g = jnp.take(kernel, label, axis=1).T.astype(jnp.float32)   # (B, D)

    # Pre-step: normalized embeddings + per-row margin quantities + t update.
    emb_n, ctm, ftl, t_new = pl.pallas_call(
        _prestep_kernel,
        out_shape=(jax.ShapeDtypeStruct((B, D), jnp.float32),
                   jax.ShapeDtypeStruct((B, 1), jnp.float32),
                   jax.ShapeDtypeStruct((B, 1), jnp.float32),
                   jax.ShapeDtypeStruct((1,), jnp.float32)),
        in_specs=[
            pl.BlockSpec(memory_space=pltpu.MemorySpace.VMEM),   # embeddings
            pl.BlockSpec(memory_space=pltpu.MemorySpace.VMEM),   # gathered cols
            pl.BlockSpec(memory_space=pltpu.MemorySpace.SMEM),   # t (scalar)
        ],
        out_specs=(
            pl.BlockSpec(memory_space=pltpu.MemorySpace.VMEM),   # emb_n
            pl.BlockSpec(memory_space=pltpu.MemorySpace.VMEM),   # cos_theta_m
            pl.BlockSpec(memory_space=pltpu.MemorySpace.VMEM),   # final_tl
            pl.BlockSpec(memory_space=pltpu.MemorySpace.SMEM),   # updated t
        ),
    )(embeddings, ker_g, t)

    # Pad C to a lane multiple (module default 200 is not aligned); the zero
    # columns are NaN-guarded in-kernel and sliced off the output.
    c_pad = ((C + 127) // 128) * 128
    kernel_p = kernel if c_pad == C else jnp.pad(kernel, ((0, 0), (0, c_pad - C)))

    tc = class_tile if class_tile is not None else _choose_class_tile(c_pad, B, D)
    assert c_pad % tc == 0, "class tile must divide padded out_features"
    n_c = c_pad // tc

    # vmem_limit from the computed double-buffered working set (generation-safe).
    need = 4 * (2 * (D * tc + B * tc) + B * D + 8 * B)
    vmem_limit = int(min(max(4 * need, 16 << 20), 64 << 20))

    # TODO(synk): if the classifier-tile DMA is still exposed at very small B,
    #             deepen pipelining with pipeline_mode=pl.Buffered(3) on the
    #             (D, tc) input spec.
    out = pl.pallas_call(
        functools.partial(_fused_kernel, matmul_dtype=matmul_dtype),
        out_shape=jax.ShapeDtypeStruct((B, c_pad), jnp.float32),
        grid=(n_c,),
        in_specs=[
            pl.BlockSpec((B, D), lambda j: (0, 0)),       # normalized emb (resident)
            pl.BlockSpec((D, tc), lambda j: (0, j)),      # classifier matrix tile
            pl.BlockSpec((B, 1), lambda j: (0, 0)),       # labels
            pl.BlockSpec((B, 1), lambda j: (0, 0)),       # cos_theta_m
            pl.BlockSpec((B, 1), lambda j: (0, 0)),       # final_target_logit
            pl.BlockSpec(memory_space=pltpu.MemorySpace.SMEM),  # t_new scalar
            pl.BlockSpec(memory_space=pltpu.MemorySpace.SMEM),  # reg_loss scalar
        ],
        out_specs=pl.BlockSpec((B, tc), lambda j: (0, j)),
        compiler_params=pltpu.CompilerParams(
            dimension_semantics=("parallel",),            # shards across TCs
            vmem_limit_bytes=vmem_limit),
    )(emb_n, kernel_p, label2d, ctm, ftl, t_new, reg)

    if c_pad != C:
        out = out[:, :C]
    return out, t_new


# -----------------------------------------------------------------------------
# Plain-JAX reference for correctness check.
# -----------------------------------------------------------------------------
def curricular_face_ref(embeddings, kernel, label, weight, t):
    emb_n = embeddings / jnp.linalg.norm(embeddings, axis=1, keepdims=True)
    ker_n = kernel / jnp.linalg.norm(kernel, axis=0, keepdims=True)
    cos_theta = jnp.clip(emb_n @ ker_n, -1.0, 1.0)
    B, C = cos_theta.shape
    target_logit = cos_theta[jnp.arange(B), label][:, None]
    sin_theta = jnp.sqrt(1.0 - target_logit ** 2)
    cos_theta_m = target_logit * COS_M - sin_theta * SIN_M
    mask = cos_theta > cos_theta_m
    final_target_logit = jnp.where(target_logit > THRESHOLD,
                                   cos_theta_m, target_logit - MM)
    t_new = jnp.mean(target_logit) * 0.01 + 0.99 * t[0]
    cos_theta = jnp.where(mask, cos_theta * (t_new + cos_theta), cos_theta)
    onehot = jax.nn.one_hot(label, C, dtype=bool)
    cos_theta = jnp.where(onehot, final_target_logit, cos_theta)
    reg = REG_COEFF * jnp.sum(jnp.square(weight))
    return cos_theta * S + reg, t_new


if __name__ == "__main__":
    B = 8
    key = jax.random.PRNGKey(0)
    k_emb, k_ker, k_w, k_lab = jax.random.split(key, 4)

    embeddings = jax.random.normal(k_emb, (B, IN_FEATURES), dtype=jnp.float32)
    # nn.init.normal_(self.kernel, std=0.01)
    kernel = 0.01 * jax.random.normal(k_ker, (IN_FEATURES, OUT_FEATURES),
                                      dtype=jnp.float32)
    # self.weight is an uninitialized Parameter in the module; init it
    # deterministically here (synthetic weights, no checkpoint load).
    weight = 0.05 * jax.random.normal(k_w, (OUT_FEATURES, IN_FEATURES),
                                      dtype=jnp.float32)
    label = jax.random.randint(k_lab, (B,), 0, OUT_FEATURES, dtype=jnp.int32)
    t_buf = jnp.zeros((1,), dtype=jnp.float32)

    out_ref, t_ref_v = curricular_face_ref(embeddings, kernel, label, weight,
                                           t_buf)

    # Default path: padded C fits one tile (n_c = 1, single fused kernel).
    fn = jax.jit(curricular_face)
    out, t_new = fn(embeddings, kernel, label, weight, t_buf)
    jax.block_until_ready(out)
    jax.block_until_ready(t_new)
    assert jnp.allclose(out, out_ref, rtol=1e-5, atol=1e-4), "logits mismatch"
    assert jnp.allclose(t_new, jnp.atleast_1d(t_ref_v),
                        rtol=1e-5, atol=1e-6), "t mismatch"

    # Tiled path: class_tile=128 exercises the 2-tile C grid at this toy size.
    # Production on v6e/v7x should keep the default tile and use
    # matmul_dtype=jnp.bfloat16 (looser-tolerance test before shipping).
    fn_tiled = jax.jit(functools.partial(curricular_face, class_tile=128))
    out2, t_new2 = fn_tiled(embeddings, kernel, label, weight, t_buf)
    jax.block_until_ready(out2)
    assert jnp.allclose(out2, out_ref, rtol=1e-5, atol=1e-4), "tiled mismatch"
    assert jnp.allclose(t_new2, jnp.atleast_1d(t_ref_v),
                        rtol=1e-5, atol=1e-6), "tiled t mismatch"

    print("KERNEL_OK")
</pallas_src>

<mosaic_0001>
module attributes {stable_mosaic.version = 11 : i64} {
  func.func @_prestep_kernel(%arg0: memref<8x128xf32, #tpu.memory_space<vmem>>, %arg1: memref<8x128xf32, #tpu.memory_space<vmem>>, %arg2: memref<1xf32, #tpu.memory_space<smem>>, %arg3: memref<8x128xf32, #tpu.memory_space<vmem>>, %arg4: memref<8x1xf32, #tpu.memory_space<vmem>>, %arg5: memref<8x1xf32, #tpu.memory_space<vmem>>, %arg6: memref<1xf32, #tpu.memory_space<smem>>) attributes {dimension_semantics = [], scalar_prefetch = 0 : i64, scratch_operands = 0 : i64, tpu.core_type = #tpu.core_type<tc>} {
    %c0 = arith.constant 0 : index
    %c0_0 = arith.constant 0 : index
    %0 = vector.load %arg0[%c0, %c0_0] : memref<8x128xf32, #tpu.memory_space<vmem>>, vector<8x128xf32>
    %1 = arith.mulf %0, %0 : vector<8x128xf32>
    %cst = arith.constant dense<0.000000e+00> : vector<8xf32>
    %2 = vector.multi_reduction <add>, %1, %cst [1] : vector<8x128xf32> to vector<8xf32>
    %3 = vector.shape_cast %2 : vector<8xf32> to vector<8x1xf32>
    %4 = math.rsqrt %3 : vector<8x1xf32>
    %5 = vector.broadcast %4 : vector<8x1xf32> to vector<8x128xf32>
    %6 = arith.mulf %0, %5 : vector<8x128xf32>
    %c0_1 = arith.constant 0 : index
    %c0_2 = arith.constant 0 : index
    %7 = vector.load %arg3[%c0_1, %c0_2] : memref<8x128xf32, #tpu.memory_space<vmem>>, vector<8x128xf32>
    tpu.vector_store %arg3[%c0_1, %c0_2], %6 {strides = array<i32>} : memref<8x128xf32, #tpu.memory_space<vmem>>, vector<8x128xf32>,
    %c0_3 = arith.constant 0 : index
    %c0_4 = arith.constant 0 : index
    %8 = vector.load %arg1[%c0_3, %c0_4] : memref<8x128xf32, #tpu.memory_space<vmem>>, vector<8x128xf32>
    %9 = arith.mulf %8, %8 : vector<8x128xf32>
    %cst_5 = arith.constant dense<0.000000e+00> : vector<8xf32>
    %10 = vector.multi_reduction <add>, %9, %cst_5 [1] : vector<8x128xf32> to vector<8xf32>
    %11 = vector.shape_cast %10 : vector<8xf32> to vector<8x1xf32>
    %cst_6 = arith.constant 1.000000e-30 : f32
    %12 = vector.broadcast %cst_6 : f32 to vector<8x1xf32>
    %13 = arith.maximumf %11, %12 : vector<8x1xf32>
    %14 = math.rsqrt %13 : vector<8x1xf32>
    %15 = vector.broadcast %14 : vector<8x1xf32> to vector<8x128xf32>
    %16 = arith.mulf %8, %15 : vector<8x128xf32>
    %17 = arith.mulf %6, %16 : vector<8x128xf32>
    %cst_7 = arith.constant dense<0.000000e+00> : vector<8xf32>
    %18 = vector.multi_reduction <add>, %17, %cst_7 [1] : vector<8x128xf32> to vector<8xf32>
    %19 = vector.shape_cast %18 : vector<8xf32> to vector<8x1xf32>
    %cst_8 = arith.constant -1.000000e+00 : f32
    %cst_9 = arith.constant 1.000000e+00 : f32
    %20 = vector.broadcast %cst_8 : f32 to vector<8x1xf32>
    %21 = arith.maximumf %20, %19 : vector<8x1xf32>
    %22 = vector.broadcast %cst_9 : f32 to vector<8x1xf32>
    %23 = arith.minimumf %22, %21 : vector<8x1xf32>
    %24 = arith.mulf %23, %23 : vector<8x1xf32>
    %cst_10 = arith.constant 1.000000e+00 : f32
    %25 = vector.broadcast %cst_10 : f32 to vector<8x1xf32>
    %26 = arith.subf %25, %24 : vector<8x1xf32>
    %cst_11 = arith.constant 0.000000e+00 : f32
    %27 = vector.broadcast %cst_11 : f32 to vector<8x1xf32>
    %28 = arith.maximumf %27, %26 : vector<8x1xf32>
    %29 = math.sqrt %28 : vector<8x1xf32>
    %cst_12 = arith.constant 0.87758255 : f32
    %30 = vector.broadcast %cst_12 : f32 to vector<8x1xf32>
    %31 = arith.mulf %23, %30 : vector<8x1xf32>
    %cst_13 = arith.constant 0.47942555 : f32
    %32 = vector.broadcast %cst_13 : f32 to vector<8x1xf32>
    %33 = arith.mulf %29, %32 : vector<8x1xf32>
    %34 = arith.subf %31, %33 : vector<8x1xf32>
    %cst_14 = arith.constant -0.87758255 : f32
    %35 = vector.broadcast %cst_14 : f32 to vector<8x1xf32>
    %36 = arith.cmpf ogt, %23, %35 : vector<8x1xf32>
    %cst_15 = arith.constant 0.239712775 : f32
    %37 = vector.broadcast %cst_15 : f32 to vector<8x1xf32>
    %38 = arith.subf %23, %37 : vector<8x1xf32>
    %39 = arith.select %36, %34, %38 : vector<8x1xi1>, vector<8x1xf32>
    %c0_16 = arith.constant 0 : index
    %c0_17 = arith.constant 0 : index
    %40 = vector.load %arg4[%c0_16, %c0_17] : memref<8x1xf32, #tpu.memory_space<vmem>>, vector<8x1xf32>
    tpu.vector_store %arg4[%c0_16, %c0_17], %34 {strides = array<i32>} : memref<8x1xf32, #tpu.memory_space<vmem>>, vector<8x1xf32>,
    %c0_18 = arith.constant 0 : index
    %c0_19 = arith.constant 0 : index
    %41 = vector.load %arg5[%c0_18, %c0_19] : memref<8x1xf32, #tpu.memory_space<vmem>>, vector<8x1xf32>
    tpu.vector_store %arg5[%c0_18, %c0_19], %39 {strides = array<i32>} : memref<8x1xf32, #tpu.memory_space<vmem>>, vector<8x1xf32>,
    %42 = vector.shape_cast %23 : vector<8x1xf32> to vector<1x8x1xf32>
    %cst_20 = arith.constant dense<0.000000e+00> : vector<1xf32>
    %43 = vector.multi_reduction <add>, %42, %cst_20 [1, 2] : vector<1x8x1xf32> to vector<1xf32>
    %44 = vector.shape_cast %43 : vector<1xf32> to vector<1x1x1xf32>
    %45 = vector.extract %44[0, 0, 0] : f32 from vector<1x1x1xf32>
    %cst_21 = arith.constant 8.000000e+00 : f32
    %46 = arith.divf %45, %cst_21 : f32
    %cst_22 = arith.constant 0.00999999977 : f32
    %47 = arith.mulf %46, %cst_22 : f32
    %c0_23 = arith.constant 0 : index
    %48 = memref.load %arg2[%c0_23] : memref<1xf32, #tpu.memory_space<smem>>
    %cst_24 = arith.constant 9.900000e-01 : f32
    %49 = arith.mulf %cst_24, %48 : f32
    %50 = arith.addf %47, %49 : f32
    %c0_25 = arith.constant 0 : index
    %51 = memref.load %arg6[%c0_25] : memref<1xf32, #tpu.memory_space<smem>>
    memref.store %50, %arg6[%c0_25] : memref<1xf32, #tpu.memory_space<smem>>
    return
  }
}

module attributes {stable_mosaic.version = 11 : i64} {
  func.func @_fused_kernel(%arg0: i32, %arg1: memref<8x128xf32, #tpu.memory_space<vmem>>, %arg2: memref<128x256xf32, #tpu.memory_space<vmem>>, %arg3: memref<8x1xi32, #tpu.memory_space<vmem>>, %arg4: memref<8x1xf32, #tpu.memory_space<vmem>>, %arg5: memref<8x1xf32, #tpu.memory_space<vmem>>, %arg6: memref<1xf32, #tpu.memory_space<smem>>, %arg7: memref<1xf32, #tpu.memory_space<smem>>, %arg8: memref<8x256xf32, #tpu.memory_space<vmem>>) attributes {dimension_semantics = [#tpu.dimension_semantics<parallel>], iteration_bounds = array<i64: 1>, scalar_prefetch = 0 : i64, scratch_operands = 0 : i64, tpu.core_type = #tpu.core_type<tc>, window_params = [{pipeline_mode = #tpu.pipeline_mode<synchronous>, transform_indices = @transform_0, window_bounds = array<i64: 8, 128>}, {transform_indices = @transform_1, window_bounds = array<i64: 128, 256>}, {pipeline_mode = #tpu.pipeline_mode<synchronous>, transform_indices = @transform_2, window_bounds = array<i64: 8, 1>}, {pipeline_mode = #tpu.pipeline_mode<synchronous>, transform_indices = @transform_3, window_bounds = array<i64: 8, 1>}, {pipeline_mode = #tpu.pipeline_mode<synchronous>, transform_indices = @transform_4, window_bounds = array<i64: 8, 1>}, {transform_indices = @transform_5, window_bounds = array<i64: 1>}, {transform_indices = @transform_6, window_bounds = array<i64: 1>}, {transform_indices = @transform_7, window_bounds = array<i64: 8, 256>}]} {
    %c0 = arith.constant 0 : index
    %c0_0 = arith.constant 0 : index
    %0 = vector.load %arg1[%c0, %c0_0] : memref<8x128xf32, #tpu.memory_space<vmem>>, vector<8x128xf32>
    %c0_1 = arith.constant 0 : index
    %c0_2 = arith.constant 0 : index
    %1 = vector.load %arg2[%c0_1, %c0_2] : memref<128x256xf32, #tpu.memory_space<vmem>>, vector<128x256xf32>
    %2 = arith.mulf %1, %1 : vector<128x256xf32>
    %cst = arith.constant dense<0.000000e+00> : vector<256xf32>
    %3 = vector.multi_reduction <add>, %2, %cst [0] : vector<128x256xf32> to vector<256xf32>
    %4 = vector.shape_cast %3 : vector<256xf32> to vector<1x256xf32>
    %cst_3 = arith.constant 1.000000e-30 : f32
    %5 = vector.broadcast %cst_3 : f32 to vector<1x256xf32>
    %6 = arith.maximumf %4, %5 : vector<1x256xf32>
    %7 = math.rsqrt %6 : vector<1x256xf32>
    %8 = vector.broadcast %7 : vector<1x256xf32> to vector<128x256xf32>
    %9 = arith.mulf %1, %8 : vector<128x256xf32>
    %cst_4 = arith.constant dense<0.000000e+00> : vector<8x256xf32>
    %10 = tpu.matmul %0, %9, %cst_4 {dimension_numbers = #tpu.dot_dimension_numbers<[1], [0], [0], [1], [0, 0, 1, 1], [], []>} : vector<8x128xf32>, vector<128x256xf32>, vector<8x256xf32> -> vector<8x256xf32>
    %cst_5 = arith.constant -1.000000e+00 : f32
    %cst_6 = arith.constant 1.000000e+00 : f32
    %11 = vector.broadcast %cst_5 : f32 to vector<8x256xf32>
    %12 = arith.maximumf %11, %10 : vector<8x256xf32>
    %13 = vector.broadcast %cst_6 : f32 to vector<8x256xf32>
    %14 = arith.minimumf %13, %12 : vector<8x256xf32>
    %c0_7 = arith.constant 0 : index
    %15 = memref.load %arg6[%c0_7] : memref<1xf32, #tpu.memory_space<smem>>
    %c0_8 = arith.constant 0 : index
    %16 = memref.load %arg7[%c0_8] : memref<1xf32, #tpu.memory_space<smem>>
    %c0_9 = arith.constant 0 : index
    %c0_10 = arith.constant 0 : index
    %17 = vector.load %arg4[%c0_9, %c0_10] : memref<8x1xf32, #tpu.memory_space<vmem>>, vector<8x1xf32>
    %c0_11 = arith.constant 0 : index
    %c0_12 = arith.constant 0 : index
    %18 = vector.load %arg5[%c0_11, %c0_12] : memref<8x1xf32, #tpu.memory_space<vmem>>, vector<8x1xf32>
    %19 = vector.broadcast %17 : vector<8x1xf32> to vector<8x256xf32>
    %20 = arith.cmpf ogt, %14, %19 : vector<8x256xf32>
    %21 = vector.broadcast %15 : f32 to vector<8x256xf32>
    %22 = arith.addf %21, %14 : vector<8x256xf32>
    %23 = arith.mulf %14, %22 : vector<8x256xf32>
    %24 = arith.select %20, %23, %14 : vector<8x256xi1>, vector<8x256xf32>
    %c0_13 = arith.constant 0 : index
    %c0_14 = arith.constant 0 : index
    %25 = vector.load %arg3[%c0_13, %c0_14] : memref<8x1xi32, #tpu.memory_space<vmem>>, vector<8x1xi32>
    %26 = tpu.iota {dimensions = array<i32: 1>} : vector<8x256xi32>
    %c256_i32 = arith.constant 256 : i32
    %27 = arith.muli %arg0, %c256_i32 : i32
    %28 = vector.broadcast %27 : i32 to vector<8x256xi32>
    %29 = arith.addi %26, %28 : vector<8x256xi32>
    %30 = vector.broadcast %25 : vector<8x1xi32> to vector<8x256xi32>
    %31 = arith.cmpi eq, %29, %30 : vector<8x256xi32>
    %32 = vector.shape_cast %18 : vector<8x1xf32> to vector<8x1xf32>
    %33 = vector.broadcast %32 : vector<8x1xf32> to vector<8x256xf32>
    %34 = arith.select %31, %33, %24 : vector<8x256xi1>, vector<8x256xf32>
    %cst_15 = arith.constant 3.200000e+01 : f32
    %35 = vector.broadcast %cst_15 : f32 to vector<8x256xf32>
    %36 = arith.mulf %34, %35 : vector<8x256xf32>
    %37 = vector.broadcast %16 : f32 to vector<8x256xf32>
    %38 = arith.addf %36, %37 : vector<8x256xf32>
    %c0_16 = arith.constant 0 : index
    %c0_17 = arith.constant 0 : index
    %39 = vector.load %arg8[%c0_16, %c0_17] : memref<8x256xf32, #tpu.memory_space<vmem>>, vector<8x256xf32>
    tpu.vector_store %arg8[%c0_16, %c0_17], %38 {strides = array<i32>} : memref<8x256xf32, #tpu.memory_space<vmem>>, vector<8x256xf32>,
    return
  }
  func.func @transform_0(%arg0: i32) -> (i32, i32) {
    %c0_i32 = arith.constant 0 : i32
    %c0_i32_0 = arith.constant 0 : i32
    %c0_i32_1 = arith.constant 0 : i32
    return %c0_i32, %c0_i32_0 : i32, i32
  }
  func.func @transform_1(%arg0: i32) -> (i32, i32) {
    %c0_i32 = arith.constant 0 : i32
    %c0_i32_0 = arith.constant 0 : i32
    return %c0_i32, %arg0 : i32, i32
  }
  func.func @transform_2(%arg0: i32) -> (i32, i32) {
    %c0_i32 = arith.constant 0 : i32
    %c0_i32_0 = arith.constant 0 : i32
    %c0_i32_1 = arith.constant 0 : i32
    return %c0_i32, %c0_i32_0 : i32, i32
  }
  func.func @transform_3(%arg0: i32) -> (i32, i32) {
    %c0_i32 = arith.constant 0 : i32
    %c0_i32_0 = arith.constant 0 : i32
    %c0_i32_1 = arith.constant 0 : i32
    return %c0_i32, %c0_i32_0 : i32, i32
  }
  func.func @transform_4(%arg0: i32) -> (i32, i32) {
    %c0_i32 = arith.constant 0 : i32
    %c0_i32_0 = arith.constant 0 : i32
    %c0_i32_1 = arith.constant 0 : i32
    return %c0_i32, %c0_i32_0 : i32, i32
  }
  func.func @transform_5(%arg0: i32) -> i32 {
    %c0_i32 = arith.constant 0 : i32
    %c0_i32_0 = arith.constant 0 : i32
    return %c0_i32 : i32
  }
  func.func @transform_6(%arg0: i32) -> i32 {
    %c0_i32 = arith.constant 0 : i32
    %c0_i32_0 = arith.constant 0 : i32
    return %c0_i32 : i32
  }
  func.func @transform_7(%arg0: i32) -> (i32, i32) {
    %c0_i32 = arith.constant 0 : i32
    %c0_i32_0 = arith.constant 0 : i32
    return %c0_i32, %arg0 : i32, i32
  }
}

</mosaic_0001>

<bundles_post_ra>
// kernel: curricular_face.2
= control target key start
LH: loop header
LB: loop body
LE: loop exit
PB: predicated region body
PF: predicated region fallthrough
CT: control target
= control target key end

     0   :  { %s183_s0 = inlined_call_operand.vmem [shape: f32[8,128], index: 0, kind: input, shape index: {}]   ;;  %s184_s1 = inlined_call_operand.vmem [shape: f32[8,128], index: 1, kind: input, shape index: {}]   ;;  %s185_s2 = inlined_call_operand.<no memory space> [shape: f32[1], index: 2, kind: input, shape index: {}]   ;;  %s186_s3 = inlined_call_operand.vmem [shape: f32[8,128], index: 3, kind: output, shape index: {0}]   ;;  %s187_s4 = inlined_call_operand.vmem [shape: f32[8,1], index: 4, kind: output, shape index: {1}]   ;;  %s188_s5 = inlined_call_operand.vmem [shape: f32[8,1], index: 5, kind: output, shape index: {2}]   ;;  %s189_s6 = inlined_call_operand.hbm [shape: f32[1], index: 6, kind: output, shape index: {3}]  }
   0x1   :  { %v27_v0 = vld [vmem:[%s184_s1] sm:$0xff] }
   0x2   :  { %v20_v1 = vld [vmem:[%s183_s0] sm:$0xff] }
   0x3   :  { %13 = vsyncpa [#allocation4], 0  ;;  %v28_v2 = vmul.f32 %v27_v0, %v27_v0  ;;  %v21_v3 = vmul.f32 %v20_v1, %v20_v1  ;;  %vm55_vm0 = vcmask 7168   ;;  %s73_s7 = smul.f32 0.99, %s185_s2  ;;  %s123_s10 = smov [#allocation3]  }
   0x5   :  { %29 = vadd.xlane.f32.xlu0 %v28_v2 }
   0x9   :  { %22 = vadd.xlane.f32.xlu0 %v21_v3 }
  0x8e   :  { %v30_v4 = vpop.xlane.xlu0 %29 }
  0x8f   :  { %v31_v5 = vmax.f32 %v30_v4, 1e-30 }
  0x91   :  { %107 = vrsqrt.f32 %v31_v5 }
  0x92   :  { %v23_v6 = vpop.xlane.xlu0 %22 }
  0x93   :  { %109 = vrsqrt.f32 %v23_v6 }
  0x9e   :  { %v108_v7 = vpop.eup %107 }
  0x9f   :  { %v33_v10 = vmul.f32 %v108_v7, %v27_v0 }
  0xa0   :  { %v110_v8 = vpop.eup %109 }
  0xa1   :  { %v25_v9 = vmul.f32 %v110_v8, %v20_v1 }
  0xa3   :  { %v34_v11 = vmul.f32 %v33_v10, %v25_v9  ;;  %26 = vst [vmem:[%s186_s3] sm:$0xff] %v25_v9 }
  0xa5   :  { %35 = vadd.xlane.f32.xlu1 %v34_v11 }
 0x12e   :  { %v36_v12 = vpop.xlane.xlu1 %35 }
 0x12f   :  { %v102_v13 = vclamps-f32 %v36_v12, 1.0 }
 0x131   :  { %v39_v14 = vmul.f32 %v102_v13, %v102_v13  ;;  %v58_v15 = vsel %vm55_vm0, %v102_v13, 0.0  ;;  %v49_v23 = vmul.f32 0.87758255, %v102_v13  ;;  %v103_v26 = vadd.f32 -0.23971277, %v102_v13 }
 0x132   :  { %59 = vadd.xlane.f32.xlu1 %v58_v15  ;;  %vm52_vm3 = vcmp.gt.f32.partialorder %v102_v13, -0.87758255 }
 0x133   :  { %v40_v16 = vsub.f32 1.0, %v39_v14 }
 0x135   :  { %v41_v17 = vmax.f32 %v40_v16, 0.0 }
 0x137   :  { %111 = vrsqrt.f32 %v41_v17  ;;  %vm44_vm1 = vcmp.eq.f32.partialorder %v41_v17, inf  ;;  %v47_v20 = vand.u32 2147483648, %v41_v17  ;;  %vm46_vm2 = vcmp.eq.f32.partialorder %v41_v17, 0.0 }
 0x144   :  { %v112_v18 = vpop.eup %111 }
 0x145   :  { %v43_v19 = vmul.f32 %v112_v18, %v41_v17 }
 0x147   :  { %v45_v21 = vsel %vm44_vm1, %v41_v17, %v43_v19 }
 0x148   :  { %v48_v22 = vsel %vm46_vm2, %v47_v20, %v45_v21 }
 0x149   :  { %v50_v24 = vmul.f32 0.47942555, %v48_v22 }
 0x14b   :  { %v51_v25 = vsub.f32 %v49_v23, %v50_v24 }
 0x14d   :  { %v54_v27 = vsel %vm52_vm3, %v51_v25, %v103_v26  ;;  %56 = vst.msk [vmem:[%s187_s4] sm:$0xff] %vm55_vm0, %v51_v25 }
 0x14e   :  { %57 = vst.msk [vmem:[%s188_s5] sm:$0xff] %vm55_vm0, %v54_v27 }
 0x1bb   :  { %v60_v28 = vpop.xlane.xlu1 %59 }
 0x1bc   :  { %v61_v29 = vrot.slane %v60_v28, 4 }
 0x1be   :  { %v62_v30 = vadd.f32 %v61_v29, %v60_v28 }
 0x1c0   :  { %v63_v31 = vrot.slane %v62_v30, 2 }
 0x1c2   :  { %v64_v32 = vadd.f32 %v63_v31, %v62_v30 }
 0x1c4   :  { %v65_v33 = vrot.slane %v64_v32, 1 }
 0x1c6   :  { %v66_v34 = vadd.f32 %v65_v33, %v64_v32 }
 0x1c8   :  { %104 = vpush %v66_v34 }
 0x1f9   :  { %s105_s28 = spop %104 }
 0x1fa   :  { %s70_s8 = smul.f32 0.125, %s105_s28 }
 0x1fc   :  { %s71_s4 = smul.f32 0.01, %s70_s8 }
 0x1fe   :  { %s74_s9 = sadd.f32 %s73_s7, %s71_s4 }
 0x200   :  { %76 = sst [smem:[#allocation3]] %s74_s9 }
 0x201   :  { %90 = dma.smem_to_hbm %s123_s10, 16, %s189_s6, [#allocation4]  }
 0x202   :  { %121 = dma.done.wait [#allocation4], 16  }
 0x203   :  { %122 = vsyncadd [#allocation4], 4294967280 }
 0x204   :  { %100 = sfence }
 0x205   :  { %101 = vsyncpa [#allocation4], 1 }

// kernel: curricular_face.3
= control target key start
LH: loop header
LB: loop body
LE: loop exit
PB: predicated region body
PF: predicated region fallthrough
CT: control target
= control target key end

     0   :  { %v339_v7 = vmov 0.0   ;;  %v340_v8 = vmov 0   ;;  %s619_s0 = inlined_call_operand.vmem [shape: f32[8,128], index: 0, kind: input, shape index: {}]   ;;  %s620_s1 = inlined_call_operand.vmem [shape: f32[128,256], index: 1, kind: input, shape index: {}]   ;;  %s621_s2 = inlined_call_operand.vmem [shape: s32[8,1], index: 2, kind: input, shape index: {}]   ;;  %s622_s3 = inlined_call_operand.vmem [shape: f32[8,1], index: 3, kind: input, shape index: {}]   ;;  %s623_s4 = inlined_call_operand.vmem [shape: f32[8,1], index: 4, kind: input, shape index: {}]   ;;  %s624_s5 = inlined_call_operand.<no memory space> [shape: f32[1], index: 5, kind: input, shape index: {}]   ;;  %s625_s6 = inlined_call_operand.<no memory space> [shape: f32[1], index: 6, kind: input, shape index: {}]   ;;  %s626_s7 = inlined_call_operand.hbm [shape: f32[8,256], index: 7, kind: output, shape index: {}]  }
   0x1   :  { %v385_v0 = vld [vmem:[%s620_s1 + $0x8] sm:$0xff]  ;;  %v390_v1 = vld [vmem:[%s620_s1 + $0x18] sm:$0xff]  ;;  %236 = vmatprep.mubr.f32.mxu0 %v339_v7  ;;  %311 = vset.pattern.permute.xlu0 %v340_v8  ;;  %v425_v15 = vld [vmem:[%s620_s1] sm:$0xff] }
   0x2   :  { %v395_v2 = vld [vmem:[%s620_s1 + $0x28] sm:$0xff]  ;;  %v400_v3 = vld [vmem:[%s620_s1 + $0x38] sm:$0xff]  ;;  %v63_v4 = vmul.f32 %v385_v0, %v385_v0  ;;  %v65_v5 = vmul.f32 %v390_v1, %v390_v1  ;;  %312 = vset.pattern.permute.xlu1 %v340_v8  ;;  %v430_v16 = vld [vmem:[%s620_s1 + $0x10] sm:$0xff]  ;;  %v62_v20 = vmul.f32 %v425_v15, %v425_v15 }
   0x3   :  { %v67_v6 = vmul.f32 %v395_v2, %v395_v2  ;;  %v411_v9 = vld [vmem:[%s620_s1 + $0x48] sm:$0xff]  ;;  %v69_v10 = vmul.f32 %v400_v3, %v400_v3  ;;  %v418_v12 = vld [vmem:[%s620_s1 + $0x58] sm:$0xff]  ;;  %v440_v18 = vld [vmem:[%s620_s1 + $0x20] sm:$0xff]  ;;  %v64_v21 = vmul.f32 %v430_v16, %v430_v16 }
   0x4   :  { %v115_v11 = vadd.f32 %v65_v5, %v63_v4  ;;  %v71_v13 = vmul.f32 %v411_v9, %v411_v9  ;;  %v435_v17 = vld [vmem:[%s620_s1 + $0x68] sm:$0xff]  ;;  %v445_v19 = vld [vmem:[%s620_s1 + $0x30] sm:$0xff]  ;;  %v73_v22 = vmul.f32 %v418_v12, %v418_v12  ;;  %v456_v24 = vld [vmem:[%s620_s1 + $0x40] sm:$0xff]  ;;  %v66_v25 = vmul.f32 %v440_v18, %v440_v18 }
   0x5   :  { %v463_v26 = vld [vmem:[%s620_s1 + $0x78] sm:$0xff]  ;;  %v68_v27 = vmul.f32 %v445_v19, %v445_v19  ;;  %v94_v28 = vadd.f32 %v64_v21, %v62_v20  ;;  %v75_v29 = vmul.f32 %v435_v17, %v435_v17  ;;  %v472_v31 = vld [vmem:[%s620_s1 + $0x50] sm:$0xff]  ;;  %v477_v32 = vld [vmem:[%s620_s1 + $0x88] sm:$0xff]  ;;  %v70_v33 = vmul.f32 %v456_v24, %v456_v24 }
   0x6   :  { %v116_v14 = vadd.f32 %v115_v11, %v67_v6  ;;  %v77_v35 = vmul.f32 %v463_v26, %v463_v26  ;;  %v486_v37 = vld [vmem:[%s620_s1 + $0x60] sm:$0xff]  ;;  %v497_v40 = vld [vmem:[%s620_s1 + $0x98] sm:$0xff]  ;;  %v72_v41 = vmul.f32 %v472_v31, %v472_v31 }
   0x7   :  { %v95_v34 = vadd.f32 %v94_v28, %v66_v25  ;;  %v249_v38 = vld [vmem:[%s622_s3] sm:$0xff] }
   0x8   :  { %v117_v23 = vadd.f32 %v116_v14, %v69_v10  ;;  %v250_v39 = vld [vmem:[%s623_s4] sm:$0xff]  ;;  %253 = vperm.xlu0 %311, %v249_v38  }
   0x9   :  { %v96_v42 = vadd.f32 %v95_v34, %v68_v27  ;;  %280 = vperm.xlu1 %312, %v250_v39  }
   0xa   :  { %v118_v30 = vadd.f32 %v117_v23, %v71_v13 }
   0xc   :  { %v119_v36 = vadd.f32 %v118_v30, %v73_v22 }
   0xd   :  { %14 = vsyncpa [#allocation5], 0  ;;  %v79_v43 = vmul.f32 %v477_v32, %v477_v32  ;;  %v506_v45 = vld [vmem:[%s620_s1 + $0x70] sm:$0xff]  ;;  %v265_v46 = vld [vmem:[%s621_s2] sm:$0xff]  ;;  %v74_v48 = vmul.f32 %v486_v37, %v486_v37  ;;  %v97_v49 = vadd.f32 %v96_v42, %v70_v33  ;;  %v81_v50 = vmul.f32 %v497_v40, %v497_v40 }
   0xe   :  { %v120_v44 = vadd.f32 %v119_v36, %v75_v29  ;;  %v514_v47 = vld [vmem:[%s620_s1 + $0xa8] sm:$0xff]  ;;  %v523_v52 = vld [vmem:[%s620_s1 + $0x80] sm:$0xff]  ;;  %v528_v53 = vld [vmem:[%s620_s1 + $0xb8] sm:$0xff]  ;;  %v76_v54 = vmul.f32 %v506_v45, %v506_v45  ;;  %274 = vperm.xlu0 %311, %v265_v46  }
   0xf   :  { %v98_v55 = vadd.f32 %v97_v49, %v72_v41  ;;  %v83_v56 = vmul.f32 %v514_v47, %v514_v47  ;;  %v537_v58 = vld [vmem:[%s620_s1 + $0x90] sm:$0xff]  ;;  %v542_v59 = vld [vmem:[%s620_s1 + $0xc8] sm:$0xff]  ;;  %v78_v60 = vmul.f32 %v523_v52, %v523_v52  ;;  %v85_v62 = vmul.f32 %v528_v53, %v528_v53  ;;  %v551_v4 = vld [vmem:[%s620_s1 + $0xa0] sm:$0xff] }
  0x10   :  { %v121_v51 = vadd.f32 %v120_v44, %v77_v35  ;;  %v57_v5 = vld [vmem:[%s620_s1 + $0xd8] sm:$0xff]  ;;  %v80_v6 = vmul.f32 %v537_v58, %v537_v58  ;;  %v87_v8 = vmul.f32 %v542_v59, %v542_v59  ;;  %v52_v11 = vld [vmem:[%s620_s1 + $0xb0] sm:$0xff]  ;;  %v59_v13 = vld [vmem:[%s620_s1 + $0xe8] sm:$0xff]  ;;  %v82_v14 = vmul.f32 %v551_v4, %v551_v4 }
  0x11   :  { %v99_v61 = vadd.f32 %v98_v55, %v74_v48  ;;  %v89_v21 = vmul.f32 %v57_v5, %v57_v5  ;;  %v54_v23 = vld [vmem:[%s620_s1 + $0xc0] sm:$0xff]  ;;  %v61_v25 = vld [vmem:[%s620_s1 + $0xf8] sm:$0xff]  ;;  %v84_v27 = vmul.f32 %v52_v11, %v52_v11  ;;  %v91_v29 = vmul.f32 %v59_v13, %v59_v13  ;;  %v56_v33 = vld [vmem:[%s620_s1 + $0xd0] sm:$0xff] }
  0x12   :  { %v122_v57 = vadd.f32 %v121_v51, %v79_v43  ;;  %v86_v34 = vmul.f32 %v54_v23, %v54_v23  ;;  %v93_v36 = vmul.f32 %v61_v25, %v61_v25  ;;  %v58_v39 = vld [vmem:[%s620_s1 + $0xe0] sm:$0xff]  ;;  %v88_v41 = vmul.f32 %v56_v33, %v56_v33  ;;  %v60_v44 = vld [vmem:[%s620_s1 + $0xf0] sm:$0xff] }
  0x13   :  { %v100_v7 = vadd.f32 %v99_v61, %v76_v54  ;;  %v90_v46 = vmul.f32 %v58_v39, %v58_v39 }
  0x14   :  { %v123_v63 = vadd.f32 %v122_v57, %v81_v50  ;;  %v92_v50 = vmul.f32 %v60_v44, %v60_v44 }
  0x15   :  { %v101_v20 = vadd.f32 %v100_v7, %v78_v60 }
  0x16   :  { %v124_v10 = vadd.f32 %v123_v63, %v83_v56 }
  0x17   :  { %v102_v28 = vadd.f32 %v101_v20, %v80_v6 }
  0x18   :  { %v125_v22 = vadd.f32 %v124_v10, %v85_v62 }
  0x19   :  { %v103_v35 = vadd.f32 %v102_v28, %v82_v14 }
  0x1a   :  { %v126_v30 = vadd.f32 %v125_v22, %v87_v8 }
  0x1b   :  { %v104_v42 = vadd.f32 %v103_v35, %v84_v27 }
  0x1c   :  { %v127_v38 = vadd.f32 %v126_v30, %v89_v21 }
  0x1d   :  { %v105_v48 = vadd.f32 %v104_v42, %v86_v34 }
  0x1e   :  { %v128_v43 = vadd.f32 %v127_v38, %v91_v29 }
  0x1f   :  { %v106_v51 = vadd.f32 %v105_v48, %v88_v41 }
  0x20   :  { %v129_v49 = vadd.f32 %v128_v43, %v93_v36 }
  0x21   :  { %v107_v55 = vadd.f32 %v106_v51, %v90_v46 }
  0x22   :  { %v130_v54 = vrot.slane %v129_v49, 4 }
  0x23   :  { %v108_v57 = vadd.f32 %v107_v55, %v92_v50 }
  0x24   :  { %v131_v56 = vadd.f32 %v130_v54, %v129_v49 }
  0x25   :  { %v109_v61 = vrot.slane %v108_v57, 4 }
  0x26   :  { %v132_v60 = vrot.slane %v131_v56, 2 }
  0x27   :  { %v110_v63 = vadd.f32 %v109_v61, %v108_v57 }
  0x28   :  { %v133_v62 = vadd.f32 %v132_v60, %v131_v56  ;;  %v287_v60 = vstv %s625_s6 }
  0x29   :  { %v111_v7 = vrot.slane %v110_v63, 2 }
  0x2a   :  { %v134_v6 = vrot.slane %v133_v62, 1 }
  0x2b   :  { %v112_v10 = vadd.f32 %v111_v7, %v110_v63 }
  0x2c   :  { %v135_v8 = vadd.f32 %v134_v6, %v133_v62 }
  0x2d   :  { %v113_v20 = vrot.slane %v112_v10, 1 }
  0x2e   :  { %v137_v14 = vmax.f32 %v135_v8, 1e-30 }
  0x2f   :  { %v114_v21 = vadd.f32 %v113_v20, %v112_v10 }
  0x30   :  { %313 = vrsqrt.f32 %v137_v14 }
  0x31   :  { %v136_v22 = vmax.f32 %v114_v21, 1e-30 }
  0x33   :  { %315 = vrsqrt.f32 %v136_v22 }
  0x3d   :  { %v314_v27 = vpop.eup %313 }
  0x3e   :  { %v171_v28 = vmul.f32 %v314_v27, %v61_v25  ;;  %v169_v30 = vmul.f32 %v314_v27, %v59_v13  ;;  %v167_v36 = vmul.f32 %v314_v27, %v57_v5  ;;  %v165_v41 = vmul.f32 %v314_v27, %v542_v59 }
  0x3f   :  { %v163_v43 = vmul.f32 %v314_v27, %v528_v53  ;;  %v161_v25 = vmul.f32 %v314_v27, %v514_v47  ;;  %v159_v5 = vmul.f32 %v314_v27, %v497_v40  ;;  %v157_v59 = vmul.f32 %v314_v27, %v477_v32 }
  0x40   :  { %172 = vmatprep.subr.mxu0 %v171_v28  ;;  %v316_v29 = vpop.eup %315 }
  0x41   :  { %v170_v34 = vmul.f32 %v316_v29, %v60_v44  ;;  %v168_v35 = vmul.f32 %v316_v29, %v58_v39  ;;  %v166_v38 = vmul.f32 %v316_v29, %v56_v33  ;;  %v164_v42 = vmul.f32 %v316_v29, %v54_v23 }
  0x42   :  { %v162_v46 = vmul.f32 %v316_v29, %v52_v11  ;;  %v160_v13 = vmul.f32 %v316_v29, %v551_v4  ;;  %v158_v33 = vmul.f32 %v316_v29, %v537_v58  ;;  %v156_v53 = vmul.f32 %v316_v29, %v523_v52 }
  0x43   :  { %173 = vmatpush1.msra.mxu0 %v170_v34  ;;  %v155_v11 = vmul.f32 %v314_v27, %v463_v26  ;;  %v154_v47 = vmul.f32 %v316_v29, %v506_v45  ;;  %v153_v4 = vmul.f32 %v314_v27, %v435_v17  ;;  %v152_v40 = vmul.f32 %v316_v29, %v486_v37 }
  0x44   :  { %174 = vmatprep.subr.mxu0 %v169_v30  ;;  %v151_v58 = vmul.f32 %v314_v27, %v418_v12  ;;  %v150_v32 = vmul.f32 %v316_v29, %v472_v31  ;;  %v149_v52 = vmul.f32 %v314_v27, %v411_v9  ;;  %v148_v26 = vmul.f32 %v316_v29, %v456_v24 }
  0x45   :  { %175 = vmatpush1.msra.mxu0 %v168_v35  ;;  %v147_v45 = vmul.f32 %v314_v27, %v400_v3  ;;  %v146_v17 = vmul.f32 %v316_v29, %v445_v19  ;;  %v145_v37 = vmul.f32 %v314_v27, %v395_v2  ;;  %v144_v12 = vmul.f32 %v316_v29, %v440_v18  ;;  %v29_v2 = vld [vmem:[%s619_s0] sm:$0xff] }
  0x46   :  { %176 = vmatprep.subr.mxu0 %v167_v36  ;;  %v143_v31 = vmul.f32 %v314_v27, %v390_v1  ;;  %v142_v9 = vmul.f32 %v316_v29, %v430_v16  ;;  %v141_v24 = vmul.f32 %v314_v27, %v385_v0  ;;  %v140_v3 = vmul.f32 %v316_v29, %v425_v15 }
  0x47   :  { %177 = vmatpush1.msra.mxu0 %v166_v38  ;;  %v266_v18 = vlaneseq  ;;  %v258_v16 = vstv %s624_s5  ;;  %s341_s5 = smov [#allocation4]  }
  0x48   :  { %178 = vmatprep.subr.mxu0 %v165_v41  ;;  %s298_s23 = sshll.u32 %s341_s5, 4  ;;  %s299_s23 = int_to_ptr.vmem [resolvable:$true] %s298_s23 }
  0x49   :  { %179 = vmatpush1.msra.mxu0 %v164_v42  ;;  %v267_v23 = vand.u32 127, %v266_v18  ;;  %s317_s24 = scalar_lea.vmem %s299_s23, 256  ;;  %p322_p1 = scmp.lt.s32.totalorder %s299_s23, %s299_s23 }
  0x4a   :  { %180 = vmatprep.subr.mxu0 %v163_v43  ;;  %p318_p0 = scmp.ne.s32.totalorder %s299_s23, %s317_s24  ;;  %p323_p2 = scmp.lt.s32.totalorder %s317_s24, %s317_s24 }
  0x4b   :  { %181 = vmatpush1.msra.mxu0 %v162_v46  ;;  %v268_v50 = vadd.s32 128, %v267_v23 }
  0x4c   :  { %182 = vmatprep.subr.mxu0 %v161_v25  ;;  %p324_p3 = por %p323_p2, %p322_p1 }
  0x4d   :  { %183 = vmatpush1.msra.mxu0 %v160_v13 }
  0x4e   :  { %184 = vmatprep.subr.mxu0 %v159_v5  ;;  %p325_p4 = pnand %p324_p3, %p318_p0 }
  0x4f   :  { %185 = vmatpush1.msra.mxu0 %v158_v33 }
  0x50   :  { %186 = vmatprep.subr.mxu0 %v157_v59 }
  0x51   :  { %187 = vmatpush1.msra.mxu0 %v156_v53 }
  0x52   :  { %188 = vmatprep.subr.mxu0 %v155_v11 }
  0x53   :  { %189 = vmatpush1.msra.mxu0 %v154_v47 }
  0x54   :  { %190 = vmatprep.subr.mxu0 %v153_v4 }
  0x55   :  { %191 = vmatpush1.msra.mxu0 %v152_v40 }
  0x56   :  { %192 = vmatprep.subr.mxu0 %v151_v58 }
  0x57   :  { %193 = vmatpush1.msra.mxu0 %v150_v32 }
  0x58   :  { %194 = vmatprep.subr.mxu0 %v149_v52 }
  0x59   :  { %195 = vmatpush1.msra.mxu0 %v148_v26 }
  0x5a   :  { %196 = vmatprep.subr.mxu0 %v147_v45 }
  0x5b   :  { %197 = vmatpush1.msra.mxu0 %v146_v17 }
  0x5c   :  { %198 = vmatprep.subr.mxu0 %v145_v37 }
  0x5d   :  { %199 = vmatpush1.msra.mxu0 %v144_v12 }
  0x5e   :  { %200 = vmatprep.subr.mxu0 %v143_v31 }
  0x5f   :  { %201 = vmatpush1.msra.mxu0 %v142_v9 }
  0x60   :  { %202 = vmatprep.subr.mxu0 %v141_v24 }
  0x61   :  { %203 = vmatpush1.msra.mxu0 %v140_v3 }
  0x62   :  { %237 = vmatmul.mubr.f32.vlgmr.msra.gmra.mxu0 %v29_v2 }
  0x83   :  { %v254_v1 = vpop.permute.xlu0 %253 }
  0x84   :  { %v281_v51 = vpop.permute.xlu1 %280 }
  0x89   :  { %v275_v48 = vpop.permute.xlu0 %274 }
  0x8a   :  { %vm276_vm1 = vcmp.eq.s32.totalorder %v267_v23, %v275_v48  ;;  %vm277_vm3 = vcmp.eq.s32.totalorder %v268_v50, %v275_v48 }
 0x122   :  { %v238_v19 = vpop.f32.mrf.mxu0 }
 0x123   :  { %v306_v0 = vclamps-f32 %v238_v19, 1.0 }
 0x124   :  { %v240_v39 = vpop.f32.mrf.mxu0 }
 0x125   :  { %v259_v15 = vadd.f32 %v306_v0, %v258_v16  ;;  %v307_v44 = vclamps-f32 %v240_v39, 1.0  ;;  %vm256_vm0 = vcmp.gt.f32.partialorder %v306_v0, %v254_v1 }
 0x127   :  { %v260_v49 = vadd.f32 %v307_v44, %v258_v16  ;;  %v261_v54 = vmul.f32 %v306_v0, %v259_v15  ;;  %vm257_vm2 = vcmp.gt.f32.partialorder %v307_v44, %v254_v1 }
 0x129   :  { %v262_v55 = vmul.f32 %v307_v44, %v260_v49  ;;  %v263_v56 = vsel %vm256_vm0, %v261_v54, %v306_v0 }
 0x12a   :  { %v283_v57 = vsel %vm276_vm1, %v281_v51, %v263_v56 }
 0x12b   :  { %v264_v61 = vsel %vm257_vm2, %v262_v55, %v307_v44  ;;  %v285_v62 = vmul.f32 32.0, %v283_v57 }
 0x12c   :  { %v284_v63 = vsel %vm277_vm3, %v281_v51, %v264_v61 }
 0x12d   :  { %v286_v6 = vmul.f32 32.0, %v284_v63  ;;  %v288_v7 = vadd.f32 %v287_v60, %v285_v62 }
 0x12f   :  { %v289_v8 = vadd.f32 %v287_v60, %v286_v6  ;;  %290 = vst [vmem:[#allocation4] sm:$0xff] %v288_v7 }
 0x131   :  { %291 = vst [vmem:[#allocation4 + $0x8] sm:$0xff] %v289_v8 }
 0x132   :  { %328 = shalt.err (!%p325_p4)
}
 0x133   :  { %301 = dma.vmem_to_hbm [thread:$0]  %s299_s23, 256, %s626_s7, [#allocation5]  }
 0x134   :  { %337 = dma.done.wait [#allocation5], 256  }
 0x135   :  { %338 = vsyncadd [#allocation5], 4294967040 }
 0x136   :  { %305 = vsyncpa [#allocation5], 1 }

</bundles_post_ra>
